<compile_context>
chip_gen: v7x
topology: tpu7x:2x2x1
jax: 0.10.0
libtpu: 0.0.40
codegen_flags: <defaults>
</compile_context>

<pallas_src>
import jax
import jax.numpy as jnp
from jax.experimental import pallas as pl
from jax.experimental.pallas import tpu as pltpu

LANE = 128
SUBLANE = 8


def _round_up(n, m):
    return ((n + m - 1) // m) * m


def mlp_kernel(x_ref,
               w1_ref, b1_ref,
               w2_ref, b2_ref,
               w3_ref, b3_ref,
               w4_ref, b4_ref,
               w5_ref, b5_ref,
               out_ref):
    """Full forward pass for one batch tile, fully resident in VMEM."""
    h = x_ref[...].astype(jnp.float32)

    # fc1 .. fc4 with ReLU.  Each bias is read exactly once; MXU accumulates in f32.
    h = jnp.maximum(
        jnp.dot(h, w1_ref[...], preferred_element_type=jnp.float32) + b1_ref[...], 0.0)
    h = jnp.maximum(
        jnp.dot(h, w2_ref[...], preferred_element_type=jnp.float32) + b2_ref[...], 0.0)
    h = jnp.maximum(
        jnp.dot(h, w3_ref[...], preferred_element_type=jnp.float32) + b3_ref[...], 0.0)
    h = jnp.maximum(
        jnp.dot(h, w4_ref[...], preferred_element_type=jnp.float32) + b4_ref[...], 0.0)

    # fc5 (no activation); output block is lane-dense (padded to a multiple of 128 cols).
    out = jnp.dot(h, w5_ref[...], preferred_element_type=jnp.float32) + b5_ref[...]
    out_ref[...] = out.astype(out_ref.dtype)


def tensile_strength_forward(x, params, *, batch_tile=None):
    """x: (B, input_size) float32. params: list of (W(in,out), b(1,out)) pairs."""
    B, input_size = x.shape
    output_size = params[-1][0].shape[1]

    # --- Pad every layer width up to a multiple of 128 lanes. ---------------------------
    # Layer 0's input width stays as-is (its block last dim equals the full array dim,
    # which is a legal block shape); every subsequent in-width matches the previous
    # padded out-width.  Padded regions are zero, so they contribute nothing.
    flat_params = []
    prev_out_p = input_size
    for (w, b) in params:
        fi, fo = w.shape
        fi_p = prev_out_p
        fo_p = _round_up(fo, LANE)
        w_p = jnp.zeros((fi_p, fo_p), w.dtype).at[:fi, :fo].set(w)
        b_p = jnp.zeros((1, fo_p), b.dtype).at[:, :fo].set(b.reshape(1, fo))
        flat_params += [w_p, b_p]
        prev_out_p = fo_p
    out_p = prev_out_p  # padded output width (multiple of 128)

    # --- Pick a large batch tile (multiple of 8 sublanes) and pad the batch to it. ------
    if batch_tile is None:
        batch_tile = min(_round_up(B, SUBLANE), 512)
    batch_tile = _round_up(batch_tile, SUBLANE)
    B_p = _round_up(B, batch_tile)
    if B_p != B:
        x = jnp.pad(x, ((0, B_p - B), (0, 0)))
    grid = (B_p // batch_tile,)

    # Weight/bias specs: full array, constant index_map -> stays VMEM-resident across steps.
    def full_spec(arr):
        return pl.BlockSpec(arr.shape, lambda i: (0, 0))

    in_specs = [pl.BlockSpec((batch_tile, input_size), lambda i: (i, 0))]
    in_specs += [full_spec(a) for a in flat_params]

    out_padded = pl.pallas_call(
        mlp_kernel,
        out_shape=jax.ShapeDtypeStruct((B_p, out_p), x.dtype),
        grid=grid,
        in_specs=in_specs,
        out_specs=pl.BlockSpec((batch_tile, out_p), lambda i: (i, 0)),
        compiler_params=pltpu.CompilerParams(
            dimension_semantics=("parallel",)),
    )(x, *flat_params)

    # Slice the lane-dense padded slab back to the true output shape (cheap XLA slice).
    return out_padded[:B, :output_size]


def init_linear(key, fan_in, fan_out):
    """Deterministic init mimicking PyTorch nn.Linear default (uniform +/- 1/sqrt(fan_in))."""
    kw, kb = jax.random.split(key)
    bound = 1.0 / jnp.sqrt(jnp.float32(fan_in))
    w = jax.random.uniform(kw, (fan_in, fan_out), jnp.float32, -bound, bound)
    b = jax.random.uniform(kb, (1, fan_out), jnp.float32, -bound, bound)
    return w, b


def reference_forward(x, params):
    h = x
    for i, (w, b) in enumerate(params):
        h = h @ w + b
        if i < len(params) - 1:
            h = jnp.maximum(h, 0.0)
    return h


if __name__ == "__main__":
    # Small shapes consistent with the module: batch=16, input_size=32, hidden=64, output=16.
    batch, input_size, hidden, output_size = 16, 32, 64, 16

    key = jax.random.PRNGKey(0)
    kx, k1, k2, k3, k4, k5 = jax.random.split(key, 6)

    x = jax.random.normal(kx, (batch, input_size), jnp.float32)

    params = [
        init_linear(k1, input_size, hidden),
        init_linear(k2, hidden, hidden),
        init_linear(k3, hidden, hidden),
        init_linear(k4, hidden, hidden),
        init_linear(k5, hidden, output_size),
    ]

    fwd = jax.jit(tensile_strength_forward)
    out = fwd(x, params)
    out = jax.block_until_ready(out)

    ref = reference_forward(x, params)
    assert out.shape == (batch, output_size)
    assert jnp.allclose(out, ref, atol=1e-5, rtol=1e-5), "mismatch vs reference"

    print("KERNEL_OK")
</pallas_src>

<mosaic_0001>
module attributes {stable_mosaic.version = 11 : i64} {
  func.func @mlp_kernel(%arg0: i32, %arg1: memref<16x32xf32, #tpu.memory_space<vmem>>, %arg2: memref<32x128xf32, #tpu.memory_space<vmem>>, %arg3: memref<1x128xf32, #tpu.memory_space<vmem>>, %arg4: memref<128x128xf32, #tpu.memory_space<vmem>>, %arg5: memref<1x128xf32, #tpu.memory_space<vmem>>, %arg6: memref<128x128xf32, #tpu.memory_space<vmem>>, %arg7: memref<1x128xf32, #tpu.memory_space<vmem>>, %arg8: memref<128x128xf32, #tpu.memory_space<vmem>>, %arg9: memref<1x128xf32, #tpu.memory_space<vmem>>, %arg10: memref<128x128xf32, #tpu.memory_space<vmem>>, %arg11: memref<1x128xf32, #tpu.memory_space<vmem>>, %arg12: memref<16x128xf32, #tpu.memory_space<vmem>>) attributes {dimension_semantics = [#tpu.dimension_semantics<parallel>], iteration_bounds = array<i64: 1>, scalar_prefetch = 0 : i64, scratch_operands = 0 : i64, tpu.core_type = #tpu.core_type<tc>, window_params = [{transform_indices = @transform_0, window_bounds = array<i64: 16, 32>}, {pipeline_mode = #tpu.pipeline_mode<synchronous>, transform_indices = @transform_1, window_bounds = array<i64: 32, 128>}, {pipeline_mode = #tpu.pipeline_mode<synchronous>, transform_indices = @transform_2, window_bounds = array<i64: 1, 128>}, {pipeline_mode = #tpu.pipeline_mode<synchronous>, transform_indices = @transform_3, window_bounds = array<i64: 128, 128>}, {pipeline_mode = #tpu.pipeline_mode<synchronous>, transform_indices = @transform_4, window_bounds = array<i64: 1, 128>}, {pipeline_mode = #tpu.pipeline_mode<synchronous>, transform_indices = @transform_5, window_bounds = array<i64: 128, 128>}, {pipeline_mode = #tpu.pipeline_mode<synchronous>, transform_indices = @transform_6, window_bounds = array<i64: 1, 128>}, {pipeline_mode = #tpu.pipeline_mode<synchronous>, transform_indices = @transform_7, window_bounds = array<i64: 128, 128>}, {pipeline_mode = #tpu.pipeline_mode<synchronous>, transform_indices = @transform_8, window_bounds = array<i64: 1, 128>}, {pipeline_mode = #tpu.pipeline_mode<synchronous>, transform_indices = @transform_9, window_bounds = array<i64: 128, 128>}, {pipeline_mode = #tpu.pipeline_mode<synchronous>, transform_indices = @transform_10, window_bounds = array<i64: 1, 128>}, {transform_indices = @transform_11, window_bounds = array<i64: 16, 128>}]} {
    %c0 = arith.constant 0 : index
    %c0_0 = arith.constant 0 : index
    %0 = vector.load %arg1[%c0, %c0_0] : memref<16x32xf32, #tpu.memory_space<vmem>>, vector<16x32xf32>
    %c0_1 = arith.constant 0 : index
    %c0_2 = arith.constant 0 : index
    %1 = vector.load %arg2[%c0_1, %c0_2] : memref<32x128xf32, #tpu.memory_space<vmem>>, vector<32x128xf32>
    %cst = arith.constant dense<0.000000e+00> : vector<16x128xf32>
    %2 = tpu.matmul %0, %1, %cst {dimension_numbers = #tpu.dot_dimension_numbers<[1], [0], [0], [1], [0, 0, 1, 1], [], []>} : vector<16x32xf32>, vector<32x128xf32>, vector<16x128xf32> -> vector<16x128xf32>
    %c0_3 = arith.constant 0 : index
    %c0_4 = arith.constant 0 : index
    %3 = vector.load %arg3[%c0_3, %c0_4] : memref<1x128xf32, #tpu.memory_space<vmem>>, vector<1x128xf32>
    %4 = vector.broadcast %3 : vector<1x128xf32> to vector<16x128xf32>
    %5 = arith.addf %2, %4 : vector<16x128xf32>
    %cst_5 = arith.constant 0.000000e+00 : f32
    %6 = vector.broadcast %cst_5 : f32 to vector<16x128xf32>
    %7 = arith.maximumf %5, %6 : vector<16x128xf32>
    %c0_6 = arith.constant 0 : index
    %c0_7 = arith.constant 0 : index
    %8 = vector.load %arg4[%c0_6, %c0_7] : memref<128x128xf32, #tpu.memory_space<vmem>>, vector<128x128xf32>
    %cst_8 = arith.constant dense<0.000000e+00> : vector<16x128xf32>
    %9 = tpu.matmul %7, %8, %cst_8 {dimension_numbers = #tpu.dot_dimension_numbers<[1], [0], [0], [1], [0, 0, 1, 1], [], []>} : vector<16x128xf32>, vector<128x128xf32>, vector<16x128xf32> -> vector<16x128xf32>
    %c0_9 = arith.constant 0 : index
    %c0_10 = arith.constant 0 : index
    %10 = vector.load %arg5[%c0_9, %c0_10] : memref<1x128xf32, #tpu.memory_space<vmem>>, vector<1x128xf32>
    %11 = vector.broadcast %10 : vector<1x128xf32> to vector<16x128xf32>
    %12 = arith.addf %9, %11 : vector<16x128xf32>
    %cst_11 = arith.constant 0.000000e+00 : f32
    %13 = vector.broadcast %cst_11 : f32 to vector<16x128xf32>
    %14 = arith.maximumf %12, %13 : vector<16x128xf32>
    %c0_12 = arith.constant 0 : index
    %c0_13 = arith.constant 0 : index
    %15 = vector.load %arg6[%c0_12, %c0_13] : memref<128x128xf32, #tpu.memory_space<vmem>>, vector<128x128xf32>
    %cst_14 = arith.constant dense<0.000000e+00> : vector<16x128xf32>
    %16 = tpu.matmul %14, %15, %cst_14 {dimension_numbers = #tpu.dot_dimension_numbers<[1], [0], [0], [1], [0, 0, 1, 1], [], []>} : vector<16x128xf32>, vector<128x128xf32>, vector<16x128xf32> -> vector<16x128xf32>
    %c0_15 = arith.constant 0 : index
    %c0_16 = arith.constant 0 : index
    %17 = vector.load %arg7[%c0_15, %c0_16] : memref<1x128xf32, #tpu.memory_space<vmem>>, vector<1x128xf32>
    %18 = vector.broadcast %17 : vector<1x128xf32> to vector<16x128xf32>
    %19 = arith.addf %16, %18 : vector<16x128xf32>
    %cst_17 = arith.constant 0.000000e+00 : f32
    %20 = vector.broadcast %cst_17 : f32 to vector<16x128xf32>
    %21 = arith.maximumf %19, %20 : vector<16x128xf32>
    %c0_18 = arith.constant 0 : index
    %c0_19 = arith.constant 0 : index
    %22 = vector.load %arg8[%c0_18, %c0_19] : memref<128x128xf32, #tpu.memory_space<vmem>>, vector<128x128xf32>
    %cst_20 = arith.constant dense<0.000000e+00> : vector<16x128xf32>
    %23 = tpu.matmul %21, %22, %cst_20 {dimension_numbers = #tpu.dot_dimension_numbers<[1], [0], [0], [1], [0, 0, 1, 1], [], []>} : vector<16x128xf32>, vector<128x128xf32>, vector<16x128xf32> -> vector<16x128xf32>
    %c0_21 = arith.constant 0 : index
    %c0_22 = arith.constant 0 : index
    %24 = vector.load %arg9[%c0_21, %c0_22] : memref<1x128xf32, #tpu.memory_space<vmem>>, vector<1x128xf32>
    %25 = vector.broadcast %24 : vector<1x128xf32> to vector<16x128xf32>
    %26 = arith.addf %23, %25 : vector<16x128xf32>
    %cst_23 = arith.constant 0.000000e+00 : f32
    %27 = vector.broadcast %cst_23 : f32 to vector<16x128xf32>
    %28 = arith.maximumf %26, %27 : vector<16x128xf32>
    %c0_24 = arith.constant 0 : index
    %c0_25 = arith.constant 0 : index
    %29 = vector.load %arg10[%c0_24, %c0_25] : memref<128x128xf32, #tpu.memory_space<vmem>>, vector<128x128xf32>
    %cst_26 = arith.constant dense<0.000000e+00> : vector<16x128xf32>
    %30 = tpu.matmul %28, %29, %cst_26 {dimension_numbers = #tpu.dot_dimension_numbers<[1], [0], [0], [1], [0, 0, 1, 1], [], []>} : vector<16x128xf32>, vector<128x128xf32>, vector<16x128xf32> -> vector<16x128xf32>
    %c0_27 = arith.constant 0 : index
    %c0_28 = arith.constant 0 : index
    %31 = vector.load %arg11[%c0_27, %c0_28] : memref<1x128xf32, #tpu.memory_space<vmem>>, vector<1x128xf32>
    %32 = vector.broadcast %31 : vector<1x128xf32> to vector<16x128xf32>
    %33 = arith.addf %30, %32 : vector<16x128xf32>
    %c0_29 = arith.constant 0 : index
    %c0_30 = arith.constant 0 : index
    %34 = vector.load %arg12[%c0_29, %c0_30] : memref<16x128xf32, #tpu.memory_space<vmem>>, vector<16x128xf32>
    tpu.vector_store %arg12[%c0_29, %c0_30], %33 {strides = array<i32>} : memref<16x128xf32, #tpu.memory_space<vmem>>, vector<16x128xf32>,
    return
  }
  func.func @transform_0(%arg0: i32) -> (i32, i32) {
    %c0_i32 = arith.constant 0 : i32
    %c0_i32_0 = arith.constant 0 : i32
    return %arg0, %c0_i32 : i32, i32
  }
  func.func @transform_1(%arg0: i32) -> (i32, i32) {
    %c0_i32 = arith.constant 0 : i32
    %c0_i32_0 = arith.constant 0 : i32
    %c0_i32_1 = arith.constant 0 : i32
    return %c0_i32, %c0_i32_0 : i32, i32
  }
  func.func @transform_2(%arg0: i32) -> (i32, i32) {
    %c0_i32 = arith.constant 0 : i32
    %c0_i32_0 = arith.constant 0 : i32
    %c0_i32_1 = arith.constant 0 : i32
    return %c0_i32, %c0_i32_0 : i32, i32
  }
  func.func @transform_3(%arg0: i32) -> (i32, i32) {
    %c0_i32 = arith.constant 0 : i32
    %c0_i32_0 = arith.constant 0 : i32
    %c0_i32_1 = arith.constant 0 : i32
    return %c0_i32, %c0_i32_0 : i32, i32
  }
  func.func @transform_4(%arg0: i32) -> (i32, i32) {
    %c0_i32 = arith.constant 0 : i32
    %c0_i32_0 = arith.constant 0 : i32
    %c0_i32_1 = arith.constant 0 : i32
    return %c0_i32, %c0_i32_0 : i32, i32
  }
  func.func @transform_5(%arg0: i32) -> (i32, i32) {
    %c0_i32 = arith.constant 0 : i32
    %c0_i32_0 = arith.constant 0 : i32
    %c0_i32_1 = arith.constant 0 : i32
    return %c0_i32, %c0_i32_0 : i32, i32
  }
  func.func @transform_6(%arg0: i32) -> (i32, i32) {
    %c0_i32 = arith.constant 0 : i32
    %c0_i32_0 = arith.constant 0 : i32
    %c0_i32_1 = arith.constant 0 : i32
    return %c0_i32, %c0_i32_0 : i32, i32
  }
  func.func @transform_7(%arg0: i32) -> (i32, i32) {
    %c0_i32 = arith.constant 0 : i32
    %c0_i32_0 = arith.constant 0 : i32
    %c0_i32_1 = arith.constant 0 : i32
    return %c0_i32, %c0_i32_0 : i32, i32
  }
  func.func @transform_8(%arg0: i32) -> (i32, i32) {
    %c0_i32 = arith.constant 0 : i32
    %c0_i32_0 = arith.constant 0 : i32
    %c0_i32_1 = arith.constant 0 : i32
    return %c0_i32, %c0_i32_0 : i32, i32
  }
  func.func @transform_9(%arg0: i32) -> (i32, i32) {
    %c0_i32 = arith.constant 0 : i32
    %c0_i32_0 = arith.constant 0 : i32
    %c0_i32_1 = arith.constant 0 : i32
    return %c0_i32, %c0_i32_0 : i32, i32
  }
  func.func @transform_10(%arg0: i32) -> (i32, i32) {
    %c0_i32 = arith.constant 0 : i32
    %c0_i32_0 = arith.constant 0 : i32
    %c0_i32_1 = arith.constant 0 : i32
    return %c0_i32, %c0_i32_0 : i32, i32
  }
  func.func @transform_11(%arg0: i32) -> (i32, i32) {
    %c0_i32 = arith.constant 0 : i32
    %c0_i32_0 = arith.constant 0 : i32
    return %arg0, %c0_i32 : i32, i32
  }
}

</mosaic_0001>

<bundles_post_ra>
// kernel: tensile_strength_forward.1
= control target key start
LH: loop header
LB: loop body
LE: loop exit
PB: predicated region body
PF: predicated region fallthrough
CT: control target
= control target key end

     0   :  { %vm52_vm0 = vcmask 261120   ;;  %s1253_s0 = inlined_call_operand.vmem [shape: f32[16,32], index: 0, kind: input, shape index: {}]   ;;  %s1254_s1 = inlined_call_operand.vmem [shape: f32[32,128], index: 1, kind: input, shape index: {}]   ;;  %s1255_s2 = inlined_call_operand.vmem [shape: f32[1,128], index: 2, kind: input, shape index: {}]   ;;  %s1256_s3 = inlined_call_operand.vmem [shape: f32[128,128], index: 3, kind: input, shape index: {}]   ;;  %s1257_s4 = inlined_call_operand.vmem [shape: f32[1,128], index: 4, kind: input, shape index: {}]   ;;  %s1258_s5 = inlined_call_operand.vmem [shape: f32[128,128], index: 5, kind: input, shape index: {}]   ;;  %s1259_s6 = inlined_call_operand.vmem [shape: f32[1,128], index: 6, kind: input, shape index: {}]   ;;  %s1260_s7 = inlined_call_operand.vmem [shape: f32[128,128], index: 7, kind: input, shape index: {}]   ;;  %s1261_s8 = inlined_call_operand.vmem [shape: f32[1,128], index: 8, kind: input, shape index: {}]   ;;  %s1262_s9 = inlined_call_operand.vmem [shape: f32[128,128], index: 9, kind: input, shape index: {}]   ;;  %s1263_s10 = inlined_call_operand.vmem [shape: f32[1,128], index: 10, kind: input, shape index: {}]   ;;  %s1264_s11 = inlined_call_operand.hbm [shape: f32[16,128], index: 11, kind: output, shape index: {}]  }
   0x1   :  { %v41_v0 = vld [vmem:[%s1254_s1] sm:$0xff]  ;;  %v42_v1 = vld [vmem:[%s1254_s1 + $0x8] sm:$0xff]  ;;  %v43_v2 = vld [vmem:[%s1254_s1 + $0x10] sm:$0xff] }
   0x2   :  { %v788_v3 = vpack.c.bf16 %v42_v1, %v41_v0  ;;  %v44_v4 = vld [vmem:[%s1254_s1 + $0x18] sm:$0xff]  ;;  %v39_v5 = vld [vmem:[%s1253_s0] sm:$0xff]  ;;  %v137_v8 = vld [vmem:[%s1256_s3 + $0x8] sm:$0xff] }
   0x3   :  { %v792_v6 = vpack.c.bf16 %v44_v4, %v43_v2  ;;  %645 = vmatprep.mubr.msk.f32.mxu0 %vm52_vm0, %v39_v5  ;;  %v136_v7 = vld [vmem:[%s1256_s3] sm:$0xff]  ;;  %v138_v9 = vld [vmem:[%s1256_s3 + $0x10] sm:$0xff]  ;;  %v139_v11 = vld [vmem:[%s1256_s3 + $0x18] sm:$0xff] }
   0x4   :  { %789 = vmatprep.subr.bf16.mxu0 %v788_v3  ;;  %v796_v10 = vpack.c.bf16 %v137_v8, %v136_v7  ;;  %v800_v12 = vpack.c.bf16 %v139_v11, %v138_v9  ;;  %v140_v13 = vld [vmem:[%s1256_s3 + $0x20] sm:$0xff]  ;;  %v141_v14 = vld [vmem:[%s1256_s3 + $0x28] sm:$0xff] }
   0x5   :  { %791 = vmatpush3.bf16.msra.mxu0 %v788_v3 }
   0x6   :  { %793 = vmatprep.subr.bf16.mxu0 %v792_v6  ;;  %797 = vmatprep.subr.bf16.mxu1 %v796_v10 }
   0x7   :  { %799 = vmatpush3.bf16.msra.mxu1 %v796_v10 }
   0x8   :  { %16 = vsyncpa [#allocation3], 0  ;;  %801 = vmatprep.subr.bf16.mxu1 %v800_v12  ;;  %v804_v15 = vpack.c.bf16 %v141_v14, %v140_v13  ;;  %v40_v16 = vld [vmem:[%s1253_s0 + $0x8] sm:$0xff]  ;;  %v142_v17 = vld [vmem:[%s1256_s3 + $0x30] sm:$0xff] }
   0x9   :  { %795 = vmatpush3.bf16.msra.mxu0 %v792_v6  ;;  %v143_v18 = vld [vmem:[%s1256_s3 + $0x38] sm:$0xff]  ;;  %v144_v20 = vld [vmem:[%s1256_s3 + $0x40] sm:$0xff]  ;;  %v145_v21 = vld [vmem:[%s1256_s3 + $0x48] sm:$0xff] }
   0xa   :  { %v808_v19 = vpack.c.bf16 %v143_v18, %v142_v17  ;;  %v812_v22 = vpack.c.bf16 %v145_v21, %v144_v20  ;;  %v146_v23 = vld [vmem:[%s1256_s3 + $0x50] sm:$0xff]  ;;  %v147_v24 = vld [vmem:[%s1256_s3 + $0x58] sm:$0xff]  ;;  %v148_v26 = vld [vmem:[%s1256_s3 + $0x60] sm:$0xff] }
   0xb   :  { %803 = vmatpush3.bf16.msra.mxu1 %v800_v12  ;;  %v816_v25 = vpack.c.bf16 %v147_v24, %v146_v23  ;;  %v149_v27 = vld [vmem:[%s1256_s3 + $0x68] sm:$0xff]  ;;  %v150_v29 = vld [vmem:[%s1256_s3 + $0x70] sm:$0xff]  ;;  %v151_v30 = vld [vmem:[%s1256_s3 + $0x78] sm:$0xff] }
   0xc   :  { %646 = vmatmul.mubr.msk.f32.vlgmr.msra.gmra.mrb[0].mxu0 %vm52_vm0, %v40_v16  ;;  %805 = vmatprep.subr.bf16.mxu1 %v804_v15  ;;  %v820_v28 = vpack.c.bf16 %v149_v27, %v148_v26  ;;  %v824_v31 = vpack.c.bf16 %v151_v30, %v150_v29  ;;  %v236_v32 = vld [vmem:[%s1258_s5] sm:$0xff]  ;;  %v237_v33 = vld [vmem:[%s1258_s5 + $0x8] sm:$0xff]  ;;  %v238_v34 = vld [vmem:[%s1258_s5 + $0x10] sm:$0xff] }
   0xd   :  { %v828_v35 = vpack.c.bf16 %v237_v33, %v236_v32  ;;  %v239_v36 = vld [vmem:[%s1258_s5 + $0x18] sm:$0xff]  ;;  %v240_v38 = vld [vmem:[%s1258_s5 + $0x20] sm:$0xff]  ;;  %v241_v39 = vld [vmem:[%s1258_s5 + $0x28] sm:$0xff] }
   0xe   :  { %v832_v37 = vpack.c.bf16 %v239_v36, %v238_v34  ;;  %v836_v40 = vpack.c.bf16 %v241_v39, %v240_v38  ;;  %v242_v41 = vld [vmem:[%s1258_s5 + $0x30] sm:$0xff]  ;;  %v243_v42 = vld [vmem:[%s1258_s5 + $0x38] sm:$0xff]  ;;  %v244_v44 = vld [vmem:[%s1258_s5 + $0x40] sm:$0xff] }
   0xf   :  { %807 = vmatpush3.bf16.msra.mxu1 %v804_v15  ;;  %829 = vmatprep.subr.bf16.mxu0 %v828_v35  ;;  %v840_v43 = vpack.c.bf16 %v243_v42, %v242_v41  ;;  %v245_v45 = vld [vmem:[%s1258_s5 + $0x48] sm:$0xff]  ;;  %v246_v47 = vld [vmem:[%s1258_s5 + $0x50] sm:$0xff]  ;;  %v247_v48 = vld [vmem:[%s1258_s5 + $0x58] sm:$0xff] }
  0x10   :  { %809 = vmatprep.subr.bf16.mxu1 %v808_v19  ;;  %831 = vmatpush3.bf16.msra.mxu0 %v828_v35  ;;  %v844_v46 = vpack.c.bf16 %v245_v45, %v244_v44  ;;  %v848_v49 = vpack.c.bf16 %v247_v48, %v246_v47  ;;  %v248_v50 = vld [vmem:[%s1258_s5 + $0x60] sm:$0xff]  ;;  %v249_v51 = vld [vmem:[%s1258_s5 + $0x68] sm:$0xff]  ;;  %v250_v60 = vld [vmem:[%s1258_s5 + $0x70] sm:$0xff] }
  0x11   :  { %833 = vmatprep.subr.bf16.mxu0 %v832_v37  ;;  %v852_v52 = vpack.c.bf16 %v249_v51, %v248_v50  ;;  %v552_v53 = vld [vmem:[%s1255_s2] ss:$0 sm:$0xff]  ;;  %v251_v61 = vld [vmem:[%s1258_s5 + $0x78] sm:$0xff]  ;;  %v337_v0 = vld [vmem:[%s1260_s7 + $0x8] sm:$0xff] }
  0x12   :  { %v856_v62 = vpack.c.bf16 %v251_v61, %v250_v60  ;;  %v336_v63 = vld [vmem:[%s1260_s7] sm:$0xff]  ;;  %v338_v1 = vld [vmem:[%s1260_s7 + $0x10] sm:$0xff]  ;;  %v339_v3 = vld [vmem:[%s1260_s7 + $0x18] sm:$0xff] }
  0x13   :  { %811 = vmatpush3.bf16.msra.mxu1 %v808_v19  ;;  %v860_v2 = vpack.c.bf16 %v337_v0, %v336_v63  ;;  %v864_v4 = vpack.c.bf16 %v339_v3, %v338_v1  ;;  %v340_v5 = vld [vmem:[%s1260_s7 + $0x20] sm:$0xff]  ;;  %v341_v6 = vld [vmem:[%s1260_s7 + $0x28] sm:$0xff]  ;;  %v342_v8 = vld [vmem:[%s1260_s7 + $0x30] sm:$0xff] }
  0x14   :  { %813 = vmatprep.subr.bf16.mxu1 %v812_v22  ;;  %835 = vmatpush3.bf16.msra.mxu0 %v832_v37  ;;  %v868_v7 = vpack.c.bf16 %v341_v6, %v340_v5  ;;  %v343_v9 = vld [vmem:[%s1260_s7 + $0x38] sm:$0xff]  ;;  %v344_v11 = vld [vmem:[%s1260_s7 + $0x40] sm:$0xff]  ;;  %v345_v12 = vld [vmem:[%s1260_s7 + $0x48] sm:$0xff] }
  0x15   :  { %837 = vmatprep.subr.bf16.mxu0 %v836_v40  ;;  %v872_v10 = vpack.c.bf16 %v343_v9, %v342_v8  ;;  %v876_v13 = vpack.c.bf16 %v345_v12, %v344_v11  ;;  %v346_v14 = vld [vmem:[%s1260_s7 + $0x50] sm:$0xff]  ;;  %v347_v15 = vld [vmem:[%s1260_s7 + $0x58] sm:$0xff]  ;;  %v348_v17 = vld [vmem:[%s1260_s7 + $0x60] sm:$0xff] }
  0x16   :  { %v880_v16 = vpack.c.bf16 %v347_v15, %v346_v14  ;;  %v349_v18 = vld [vmem:[%s1260_s7 + $0x68] sm:$0xff]  ;;  %v555_v20 = vld [vmem:[%s1257_s4] ss:$0 sm:$0xff]  ;;  %v350_v27 = vld [vmem:[%s1260_s7 + $0x70] sm:$0xff] }
  0x17   :  { %815 = vmatpush3.bf16.msra.mxu1 %v812_v22  ;;  %v884_v19 = vpack.c.bf16 %v349_v18, %v348_v17  ;;  %v436_v30 = vld [vmem:[%s1262_s9] sm:$0xff]  ;;  %v438_v32 = vld [vmem:[%s1262_s9 + $0x10] sm:$0xff]  ;;  %v439_v34 = vld [vmem:[%s1262_s9 + $0x18] sm:$0xff] }
  0x18   :  { %817 = vmatprep.subr.bf16.mxu1 %v816_v25  ;;  %839 = vmatpush3.bf16.msra.mxu0 %v836_v40  ;;  %v896_v35 = vpack.c.bf16 %v439_v34, %v438_v32  ;;  %v440_v36 = vld [vmem:[%s1262_s9 + $0x20] sm:$0xff]  ;;  %v441_v37 = vld [vmem:[%s1262_s9 + $0x28] sm:$0xff]  ;;  %v442_v39 = vld [vmem:[%s1262_s9 + $0x30] sm:$0xff] }
  0x19   :  { %841 = vmatprep.subr.bf16.mxu0 %v840_v43  ;;  %v900_v38 = vpack.c.bf16 %v441_v37, %v440_v36  ;;  %v443_v40 = vld [vmem:[%s1262_s9 + $0x38] sm:$0xff]  ;;  %v444_v42 = vld [vmem:[%s1262_s9 + $0x40] sm:$0xff]  ;;  %v446_v45 = vld [vmem:[%s1262_s9 + $0x50] sm:$0xff] }
  0x1a   :  { %v904_v41 = vpack.c.bf16 %v443_v40, %v442_v39  ;;  %v448_v48 = vld [vmem:[%s1262_s9 + $0x60] sm:$0xff] }
  0x1b   :  { %819 = vmatpush3.bf16.msra.mxu1 %v816_v25  ;;  %v556_v51 = vld [vmem:[%s1259_s6] ss:$0 sm:$0xff] }
  0x1c   :  { %821 = vmatprep.subr.bf16.mxu1 %v820_v28  ;;  %843 = vmatpush3.bf16.msra.mxu0 %v840_v43  ;;  %v445_v43 = vld [vmem:[%s1262_s9 + $0x48] sm:$0xff]  ;;  %v557_v61 = vld [vmem:[%s1261_s8] ss:$0 sm:$0xff] }
  0x1d   :  { %845 = vmatprep.subr.bf16.mxu0 %v844_v46  ;;  %v908_v44 = vpack.c.bf16 %v445_v43, %v444_v42 }
  0x1f   :  { %823 = vmatpush3.bf16.msra.mxu1 %v820_v28  ;;  %v351_v28 = vld [vmem:[%s1260_s7 + $0x78] sm:$0xff] }
  0x20   :  { %825 = vmatprep.subr.bf16.mxu1 %v824_v31  ;;  %847 = vmatpush3.bf16.msra.mxu0 %v844_v46  ;;  %v888_v29 = vpack.c.bf16 %v351_v28, %v350_v27  ;;  %v447_v46 = vld [vmem:[%s1262_s9 + $0x58] sm:$0xff] }
  0x21   :  { %849 = vmatprep.subr.bf16.mxu0 %v848_v49  ;;  %v912_v47 = vpack.c.bf16 %v447_v46, %v446_v45 }
  0x23   :  { %827 = vmatpush3.bf16.msra.mxu1 %v824_v31  ;;  %v437_v31 = vld [vmem:[%s1262_s9 + $0x8] sm:$0xff] }
  0x24   :  { %851 = vmatpush3.bf16.msra.mxu0 %v848_v49  ;;  %861 = vmatprep.subr.bf16.mxu1 %v860_v2  ;;  %v892_v33 = vpack.c.bf16 %v437_v31, %v436_v30  ;;  %v449_v49 = vld [vmem:[%s1262_s9 + $0x68] sm:$0xff] }
  0x25   :  { %853 = vmatprep.subr.bf16.mxu0 %v852_v52  ;;  %v916_v50 = vpack.c.bf16 %v449_v49, %v448_v48 }
  0x28   :  { %855 = vmatpush3.bf16.msra.mxu0 %v852_v52 }
  0x29   :  { %857 = vmatprep.subr.bf16.mxu0 %v856_v62 }
  0x2c   :  { %859 = vmatpush3.bf16.msra.mxu0 %v856_v62 }
  0x2d   :  { %893 = vmatprep.subr.bf16.mxu0 %v892_v33 }
  0xdf   :  { %v647_v54 = vpop.f32.mrb[0].mxu0 }
  0xe0   :  { %v131_v55 = vadd.f32 %v647_v54, %v552_v53  ;;  %v125_v56 = vpop.f32.mrb[1].mxu0 }
  0xe1   :  { %v126_v57 = vadd.f32 %v552_v53, %v125_v56 }
  0xe2   :  { %v135_v59 = vmax.f32 %v131_v55, 0.0 }
  0xe3   :  { %v134_v58 = vmax.f32 %v126_v57, 0.0 }
  0xe5   :  { %680 = vmatprep.mubr.f32.mxu1 %v134_v58  ;;  %v450_v58 = vld [vmem:[%s1262_s9 + $0x70] sm:$0xff] }
  0xe6   :  { %681 = vmatmul.mubr.f32.vlgmr.msra.gmra.mrb[0].mxu1 %v135_v59  ;;  %v451_v59 = vld [vmem:[%s1262_s9 + $0x78] sm:$0xff]  ;;  %s951_s9 = smov [#allocation2]  }
  0xe7   :  { %863 = vmatpush3.bf16.msra.mxu1 %v860_v2  ;;  %v920_v60 = vpack.c.bf16 %v451_v59, %v450_v58  ;;  %s541_s27 = sshll.u32 %s951_s9, 4  ;;  %s542_s27 = int_to_ptr.vmem [resolvable:$true] %s541_s27 }
  0xe8   :  { %865 = vmatprep.subr.bf16.mxu1 %v864_v4  ;;  %s927_s8 = scalar_lea.vmem %s542_s27, 256  ;;  %p932_p1 = scmp.lt.s32.totalorder %s542_s27, %s542_s27 }
  0xe9   :  { %p928_p0 = scmp.ne.s32.totalorder %s542_s27, %s927_s8  ;;  %p933_p2 = scmp.lt.s32.totalorder %s927_s8, %s927_s8 }
  0xeb   :  { %867 = vmatpush3.bf16.msra.mxu1 %v864_v4  ;;  %v558_v4 = vld [vmem:[%s1263_s10] ss:$0 sm:$0xff]  ;;  %p934_p3 = por %p933_p2, %p932_p1 }
  0xec   :  { %869 = vmatprep.subr.bf16.mxu1 %v868_v7 }
  0xed   :  { %p935_p4 = pnand %p934_p3, %p928_p0 }
  0xef   :  { %871 = vmatpush3.bf16.msra.mxu1 %v868_v7 }
  0xf0   :  { %873 = vmatprep.subr.bf16.mxu1 %v872_v10 }
  0xf3   :  { %875 = vmatpush3.bf16.msra.mxu1 %v872_v10 }
  0xf4   :  { %877 = vmatprep.subr.bf16.mxu1 %v876_v13 }
  0xf7   :  { %879 = vmatpush3.bf16.msra.mxu1 %v876_v13 }
  0xf8   :  { %881 = vmatprep.subr.bf16.mxu1 %v880_v16 }
  0xfb   :  { %883 = vmatpush3.bf16.msra.mxu1 %v880_v16 }
  0xfc   :  { %885 = vmatprep.subr.bf16.mxu1 %v884_v19 }
  0xff   :  { %887 = vmatpush3.bf16.msra.mxu1 %v884_v19 }
 0x100   :  { %889 = vmatprep.subr.bf16.mxu1 %v888_v29 }
 0x103   :  { %891 = vmatpush3.bf16.msra.mxu1 %v888_v29 }
 0x1b9   :  { %v682_v21 = vpop.f32.mrb[0].mxu1 }
 0x1ba   :  { %v231_v22 = vadd.f32 %v682_v21, %v555_v20  ;;  %v225_v23 = vpop.f32.mrb[1].mxu1 }
 0x1bb   :  { %v226_v24 = vadd.f32 %v555_v20, %v225_v23 }
 0x1bc   :  { %v235_v26 = vmax.f32 %v231_v22, 0.0 }
 0x1bd   :  { %v234_v25 = vmax.f32 %v226_v24, 0.0 }
 0x1bf   :  { %715 = vmatprep.mubr.f32.mxu0 %v234_v25 }
 0x1c0   :  { %716 = vmatmul.mubr.f32.vlgmr.msra.gmra.mrb[2].mxu0 %v235_v26 }
 0x1c1   :  { %895 = vmatpush3.bf16.msra.mxu0 %v892_v33 }
 0x1c2   :  { %897 = vmatprep.subr.bf16.mxu0 %v896_v35 }
 0x1c5   :  { %899 = vmatpush3.bf16.msra.mxu0 %v896_v35 }
 0x1c6   :  { %901 = vmatprep.subr.bf16.mxu0 %v900_v38 }
 0x1c9   :  { %903 = vmatpush3.bf16.msra.mxu0 %v900_v38 }
 0x1ca   :  { %905 = vmatprep.subr.bf16.mxu0 %v904_v41 }
 0x1cd   :  { %907 = vmatpush3.bf16.msra.mxu0 %v904_v41 }
 0x1ce   :  { %909 = vmatprep.subr.bf16.mxu0 %v908_v44 }
 0x1d1   :  { %911 = vmatpush3.bf16.msra.mxu0 %v908_v44 }
 0x1d2   :  { %913 = vmatprep.subr.bf16.mxu0 %v912_v47 }
 0x1d5   :  { %915 = vmatpush3.bf16.msra.mxu0 %v912_v47 }
 0x1d6   :  { %917 = vmatprep.subr.bf16.mxu0 %v916_v50 }
 0x1d9   :  { %919 = vmatpush3.bf16.msra.mxu0 %v916_v50 }
 0x1da   :  { %921 = vmatprep.subr.bf16.mxu0 %v920_v60 }
 0x1dd   :  { %923 = vmatpush3.bf16.msra.mxu0 %v920_v60 }
 0x293   :  { %v717_v52 = vpop.f32.mrb[2].mxu0 }
 0x294   :  { %v331_v53 = vadd.f32 %v717_v52, %v556_v51  ;;  %v325_v54 = vpop.f32.mrb[3].mxu0 }
 0x295   :  { %v326_v55 = vadd.f32 %v556_v51, %v325_v54 }
 0x296   :  { %v335_v57 = vmax.f32 %v331_v53, 0.0 }
 0x297   :  { %v334_v56 = vmax.f32 %v326_v55, 0.0 }
 0x299   :  { %750 = vmatprep.mubr.f32.mxu1 %v334_v56 }
 0x29a   :  { %751 = vmatmul.mubr.f32.vlgmr.msra.gmra.mrb[2].mxu1 %v335_v57 }
 0x36d   :  { %v752_v62 = vpop.f32.mrb[2].mxu1 }
 0x36e   :  { %v431_v63 = vadd.f32 %v752_v62, %v557_v61  ;;  %v425_v0 = vpop.f32.mrb[3].mxu1 }
 0x36f   :  { %v426_v1 = vadd.f32 %v557_v61, %v425_v0 }
 0x370   :  { %v435_v3 = vmax.f32 %v431_v63, 0.0 }
 0x371   :  { %v434_v2 = vmax.f32 %v426_v1, 0.0 }
 0x373   :  { %785 = vmatprep.mubr.f32.mxu0 %v434_v2 }
 0x374   :  { %786 = vmatmul.mubr.f32.vlgmr.msra.gmra.mrb[4].mxu0 %v435_v3 }
 0x447   :  { %v787_v5 = vpop.f32.mrb[4].mxu0 }
 0x448   :  { %v531_v6 = vadd.f32 %v787_v5, %v558_v4  ;;  %v525_v7 = vpop.f32.mrb[5].mxu0 }
 0x449   :  { %v526_v8 = vadd.f32 %v558_v4, %v525_v7 }
 0x44a   :  { %535 = vst [vmem:[#allocation2 + $0x8] sm:$0xff] %v531_v6 }
 0x44b   :  { %534 = vst [vmem:[#allocation2] sm:$0xff] %v526_v8 }
 0x44c   :  { %938 = shalt.err (!%p935_p4)
}
 0x44d   :  { %s939_s10 = scalar_lea.hbm %s1264_s11, 256 }
 0x44e   :  { %p940_p5 = scmp.ne.s32.totalorder %s1264_s11, %s939_s10  ;;  %p943_p6 = scmp.lt.u32.totalorder %s939_s10, %s1264_s11 }
 0x450   :  { %p945_p7 = pnand %p943_p6, %p940_p5 }
 0x452   :  { %948 = shalt.err (!%p945_p7)
}
 0x453   :  { %s952_s12 = smov 128   ;;  %s953_s13 = smov 8  }
 0x454   :  { %547 = dma.vmem_to_hbm [thread:$0]  %s542_s27, 256, %s1264_s11, [#allocation3], %s952_s12, %s952_s12, %s953_s13  }
 0x455   :  { %949 = dma.done.wait [#allocation3], 256  }
 0x456   :  { %950 = vsyncadd [#allocation3], 4294967040 }
 0x457   :  { %551 = vsyncpa [#allocation3], 1 }

</bundles_post_ra>
